<compile_context>
chip_gen: v7x
topology: tpu7x:2x2x1
jax: 0.10.0
libtpu: 0.0.40
codegen_flags: <defaults>
</compile_context>

<pallas_src>
import functools

import jax
import jax.numpy as jnp
import numpy as np
from jax.experimental import pallas as pl
from jax.experimental.pallas import tpu as pltpu

# matches torch's literal `x / 1.41421` (constant folded on host; multiply on VPU)
_INV_1_41421 = 1.0 / 1.41421


def _gelu_erf(f):
    """fused_gelu(f) = f*0.5*(1+erf(f*_INV_1_41421)), f32 math.

    erf via Abramowitz & Stegun 7.1.26 (|abs err| < 1.5e-7 ~ f32 noise); the
    sign handling is folded into a single select: 1+erf(u) = (f>=0 ? 2-q : q).
    exp lands on the EUP slot (free); the divide for `t` is kept exact.
    TODO(synk): exact lax.erf has no guaranteed Mosaic lowering; polynomial used.
    """
    a1, a2, a3, a4, a5 = (0.254829592, -0.284496736, 1.421413741,
                          -1.453152027, 1.061405429)
    p = 0.3275911
    u = f * _INV_1_41421
    au = jnp.abs(u)
    t = 1.0 / (1.0 + p * au)
    poly = t * (a1 + t * (a2 + t * (a3 + t * (a4 + t * a5))))
    q = poly * jnp.exp(-au * au)              # q = 1 - erf(|u|)
    gate = jnp.where(f >= 0.0, 2.0 - q, q)    # = 1 + erf(u)
    return (0.5 * f) * gate


def _mlp_kernel(x_ref, w_fc_ref, b_fc_ref, w_proj_ref, b_proj_ref,
                o_ref, acc_ref, *, compute_dtype):
    h = pl.program_id(1)

    @pl.when(h == 0)
    def _():
        acc_ref[...] = jnp.zeros_like(acc_ref)

    # c_fc partial: (TM, C) x (C, tH) -> f32 (TM, tH)
    f = jnp.dot(x_ref[...], w_fc_ref[...],
                preferred_element_type=jnp.float32) + b_fc_ref[...]
    g = _gelu_erf(f)                           # f32 VPU/EUP work between matmuls
    # c_proj partial, accumulated in f32 VMEM scratch
    acc_ref[...] += jnp.dot(g.astype(compute_dtype), w_proj_ref[...],
                            preferred_element_type=jnp.float32)

    @pl.when(h == pl.num_programs(1) - 1)
    def _():
        # dropout(p=0.0) == identity
        o_ref[...] = (acc_ref[...] + b_proj_ref[...]).astype(o_ref.dtype)


def pallas_mlp(x, w_fc, b_fc, w_proj, b_proj, *,
               block_rows=None, hidden_block=None,
               compute_dtype=jnp.bfloat16):
    """x: (..., C).  Weights stored transposed: w_fc (C,4C), w_proj (4C,C);
    biases broadcastable to (1,4C)/(1,C).  Matmul operands are cast to
    `compute_dtype` (bf16 default, f32 accumulation & f32 GELU)."""
    orig_shape = x.shape
    out_dtype = x.dtype
    C = orig_shape[-1]
    H = w_fc.shape[1]

    x2 = x.reshape(-1, C)
    N = x2.shape[0]

    # Row tiling: single grid step while N is small (per-step overhead ~0.35us
    # dominates toy shapes on any chip); cap at 512 rows at larger N so row DMA
    # pipelines and v7x's two TensorCores both get "parallel" steps.
    if block_rows is None:
        block_rows = N if N <= 512 else 512
    block_rows = max(8, ((min(block_rows, N) + 7) // 8) * 8)
    n_row_blocks = pl.cdiv(N, block_rows)
    Np = n_row_blocks * block_rows
    if Np != N:
        x2 = jnp.pad(x2, ((0, Np - N), (0, 0)))   # padded rows sliced off below

    # Hidden (4C) tiling: keep only (C,tH)+(tH,C) weight tiles + the f32
    # accumulator resident.  tH must be a multiple of 128 or the full H.
    if hidden_block is None:
        hidden_block = H if H <= 512 else 512
    if hidden_block != H:
        hidden_block = max(128, (hidden_block // 128) * 128)
    if H % hidden_block != 0:
        hidden_block = H
    n_h_blocks = H // hidden_block

    # Operand dtypes: matmul inputs in compute_dtype, biases stay f32.
    x2c = x2.astype(compute_dtype)
    w_fc_c = jnp.asarray(w_fc, compute_dtype)
    w_proj_c = jnp.asarray(w_proj, compute_dtype)
    b_fc_f = jnp.asarray(b_fc, jnp.float32).reshape(1, H)
    b_proj_f = jnp.asarray(b_proj, jnp.float32).reshape(1, C)

    row_resident = (n_row_blocks == 1)   # x index_map constant across grid
    h_resident = (n_h_blocks == 1)       # weight/bias index_maps constant

    # Compiler params: raise the scoped-VMEM limit only once tiles get big.
    bw = jnp.dtype(compute_dtype).itemsize
    est_bytes = (2 * block_rows * C * bw                       # x tile (dbl buf)
                 + 2 * 2 * C * hidden_block * bw               # w_fc + w_proj tiles
                 + 2 * (hidden_block + C) * 4                  # biases (f32)
                 + 2 * block_rows * C * 4                      # out tile
                 + block_rows * C * 4                          # accumulator
                 + 4 * block_rows * hidden_block * 4)          # f/g intermediates
    cp_kwargs = dict(dimension_semantics=("parallel", "arbitrary"))
    if est_bytes > 12 * 1024 * 1024:
        cp_kwargs["vmem_limit_bytes"] = min(int(est_bytes * 1.25), 64 * 1024 * 1024)

    def _run(single_buffer_ok):
        def _spec(shape, index_map, resident):
            # Grid-invariant operands: don't reserve a second VMEM buffer.
            if resident and single_buffer_ok:
                return pl.BlockSpec(shape, index_map,
                                    pipeline_mode=pl.Buffered(1))
            return pl.BlockSpec(shape, index_map)

        grid_spec = pltpu.PrefetchScalarGridSpec(
            num_scalar_prefetch=0,
            grid=(n_row_blocks, n_h_blocks),
            in_specs=[
                _spec((block_rows, C), lambda i, h: (i, 0), row_resident),  # x rows
                _spec((C, hidden_block), lambda i, h: (0, h), h_resident),  # w_fc
                _spec((1, hidden_block), lambda i, h: (0, h), h_resident),  # b_fc
                _spec((hidden_block, C), lambda i, h: (h, 0), h_resident),  # w_proj
                _spec((1, C), lambda i, h: (0, 0), True),                   # b_proj
            ],
            out_specs=pl.BlockSpec((block_rows, C), lambda i, h: (i, 0)),
            scratch_shapes=[pltpu.VMEM((block_rows, C), jnp.float32)],
        )
        # TODO(synk): if n_embd stays <128 at large N, pack a lane-dense
        # (rows*C/128, 128) output slab to avoid masked vst (low priority).
        return pl.pallas_call(
            functools.partial(_mlp_kernel, compute_dtype=compute_dtype),
            out_shape=jax.ShapeDtypeStruct((Np, C), out_dtype),
            grid_spec=grid_spec,
            compiler_params=pltpu.CompilerParams(**cp_kwargs),
        )(x2c, w_fc_c, b_fc_f, w_proj_c, b_proj_f)

    try:
        out = _run(True)
    except Exception:
        # pl.Buffered(1) single-buffering not accepted -> default double buffering.
        out = _run(False)

    if Np != N:
        out = out[:N]
    return out.reshape(orig_shape)


if __name__ == "__main__":
    # config: n_embd=32, bias=True, dropout=0.0 ;  x: (batch=2, seq=8, n_embd=32)
    B, T, C = 2, 8, 32
    H = 4 * C

    key = jax.random.PRNGKey(0)
    ks = jax.random.split(key, 5)
    sc = 0.05
    w_fc = (jax.random.normal(ks[0], (C, H)) * sc).astype(jnp.float32)
    b_fc = (jax.random.normal(ks[1], (1, H)) * sc).astype(jnp.float32)
    w_proj = (jax.random.normal(ks[2], (H, C)) * sc).astype(jnp.float32)
    b_proj = (jax.random.normal(ks[3], (1, C)) * sc).astype(jnp.float32)
    x = jax.random.normal(ks[4], (B, T, C), jnp.float32)

    def reference_mlp(v):
        f = v @ w_fc + b_fc
        g = f * 0.5 * (1.0 + jax.lax.erf(f / 1.41421))
        return g @ w_proj + b_proj          # dropout(p=0) == identity

    ref = jax.block_until_ready(reference_mlp(x))

    # f32 operands: tight-tolerance check against the f32 reference
    out_f32 = jax.block_until_ready(
        pallas_mlp(x, w_fc, b_fc, w_proj, b_proj, compute_dtype=jnp.float32))
    assert out_f32.shape == (B, T, C) and out_f32.dtype == jnp.float32
    np.testing.assert_allclose(np.asarray(out_f32), np.asarray(ref),
                               atol=2e-4, rtol=2e-4)

    # default path: bf16 MXU operands, f32 GELU + accumulate (perf-review item)
    out_bf16 = jax.block_until_ready(pallas_mlp(x, w_fc, b_fc, w_proj, b_proj))
    np.testing.assert_allclose(np.asarray(out_bf16), np.asarray(ref),
                               atol=1e-2, rtol=1e-2)

    # multi-step row tiling: exercises the pipelined/accumulator code path
    out_tiled = jax.block_until_ready(
        pallas_mlp(x, w_fc, b_fc, w_proj, b_proj,
                   compute_dtype=jnp.float32, block_rows=8))
    np.testing.assert_allclose(np.asarray(out_tiled), np.asarray(ref),
                               atol=2e-4, rtol=2e-4)

    print("KERNEL_OK")
</pallas_src>

<mosaic_0001>
module attributes {stable_mosaic.version = 11 : i64} {
  func.func @_mlp_kernel(%arg0: i32, %arg1: i32, %arg2: memref<16x32xf32, #tpu.memory_space<vmem>>, %arg3: memref<32x128xf32, #tpu.memory_space<vmem>>, %arg4: memref<1x128xf32, #tpu.memory_space<vmem>>, %arg5: memref<128x32xf32, #tpu.memory_space<vmem>>, %arg6: memref<1x32xf32, #tpu.memory_space<vmem>>, %arg7: memref<16x32xf32, #tpu.memory_space<vmem>>, %arg8: memref<16x32xf32, #tpu.memory_space<vmem>>) attributes {dimension_semantics = [#tpu.dimension_semantics<parallel>, #tpu.dimension_semantics<arbitrary>], iteration_bounds = array<i64: 1, 1>, scalar_prefetch = 0 : i64, scratch_operands = 1 : i64, tpu.core_type = #tpu.core_type<tc>, window_params = [{pipeline_mode = #tpu.pipeline_mode<synchronous>, transform_indices = @transform_0, window_bounds = array<i64: 16, 32>}, {pipeline_mode = #tpu.pipeline_mode<synchronous>, transform_indices = @transform_1, window_bounds = array<i64: 32, 128>}, {pipeline_mode = #tpu.pipeline_mode<synchronous>, transform_indices = @transform_2, window_bounds = array<i64: 1, 128>}, {pipeline_mode = #tpu.pipeline_mode<synchronous>, transform_indices = @transform_3, window_bounds = array<i64: 128, 32>}, {pipeline_mode = #tpu.pipeline_mode<synchronous>, transform_indices = @transform_4, window_bounds = array<i64: 1, 32>}, {transform_indices = @transform_5, window_bounds = array<i64: 16, 32>}]} {
    %c0_i32 = arith.constant 0 : i32
    %0 = arith.cmpi eq, %arg1, %c0_i32 : i32
    %1 = arith.extui %0 : i1 to i32
    %c0_i32_0 = arith.constant 0 : i32
    %2 = arith.cmpi ne, %1, %c0_i32_0 : i32
    scf.if %2 {
      %cst_28 = arith.constant 0.000000e+00 : f32
      %53 = vector.broadcast %cst_28 : f32 to vector<16x32xf32>
      %c0_29 = arith.constant 0 : index
      %c0_30 = arith.constant 0 : index
      %54 = vector.load %arg8[%c0_29, %c0_30] : memref<16x32xf32, #tpu.memory_space<vmem>>, vector<16x32xf32>
      tpu.vector_store %arg8[%c0_29, %c0_30], %53 {strides = array<i32>} : memref<16x32xf32, #tpu.memory_space<vmem>>, vector<16x32xf32>,
    } else {
    }
    %c0 = arith.constant 0 : index
    %c0_1 = arith.constant 0 : index
    %3 = vector.load %arg2[%c0, %c0_1] : memref<16x32xf32, #tpu.memory_space<vmem>>, vector<16x32xf32>
    %c0_2 = arith.constant 0 : index
    %c0_3 = arith.constant 0 : index
    %4 = vector.load %arg3[%c0_2, %c0_3] : memref<32x128xf32, #tpu.memory_space<vmem>>, vector<32x128xf32>
    %cst = arith.constant dense<0.000000e+00> : vector<16x128xf32>
    %5 = tpu.matmul %3, %4, %cst {dimension_numbers = #tpu.dot_dimension_numbers<[1], [0], [0], [1], [0, 0, 1, 1], [], []>} : vector<16x32xf32>, vector<32x128xf32>, vector<16x128xf32> -> vector<16x128xf32>
    %c0_4 = arith.constant 0 : index
    %c0_5 = arith.constant 0 : index
    %6 = vector.load %arg4[%c0_4, %c0_5] : memref<1x128xf32, #tpu.memory_space<vmem>>, vector<1x128xf32>
    %7 = vector.broadcast %6 : vector<1x128xf32> to vector<16x128xf32>
    %8 = arith.addf %5, %7 : vector<16x128xf32>
    %cst_6 = arith.constant 0.707108557 : f32
    %9 = vector.broadcast %cst_6 : f32 to vector<16x128xf32>
    %10 = arith.mulf %8, %9 : vector<16x128xf32>
    %11 = math.absf %10 : vector<16x128xf32>
    %cst_7 = arith.constant 0.327591091 : f32
    %12 = vector.broadcast %cst_7 : f32 to vector<16x128xf32>
    %13 = arith.mulf %12, %11 : vector<16x128xf32>
    %cst_8 = arith.constant 1.000000e+00 : f32
    %14 = vector.broadcast %cst_8 : f32 to vector<16x128xf32>
    %15 = arith.addf %14, %13 : vector<16x128xf32>
    %cst_9 = arith.constant 1.000000e+00 : f32
    %16 = vector.broadcast %cst_9 : f32 to vector<16x128xf32>
    %17 = arith.divf %16, %15 : vector<16x128xf32>
    %cst_10 = arith.constant 1.06140542 : f32
    %18 = vector.broadcast %cst_10 : f32 to vector<16x128xf32>
    %19 = arith.mulf %17, %18 : vector<16x128xf32>
    %cst_11 = arith.constant -1.45315206 : f32
    %20 = vector.broadcast %cst_11 : f32 to vector<16x128xf32>
    %21 = arith.addf %20, %19 : vector<16x128xf32>
    %22 = arith.mulf %17, %21 : vector<16x128xf32>
    %cst_12 = arith.constant 1.42141378 : f32
    %23 = vector.broadcast %cst_12 : f32 to vector<16x128xf32>
    %24 = arith.addf %23, %22 : vector<16x128xf32>
    %25 = arith.mulf %17, %24 : vector<16x128xf32>
    %cst_13 = arith.constant -0.284496725 : f32
    %26 = vector.broadcast %cst_13 : f32 to vector<16x128xf32>
    %27 = arith.addf %26, %25 : vector<16x128xf32>
    %28 = arith.mulf %17, %27 : vector<16x128xf32>
    %cst_14 = arith.constant 0.254829586 : f32
    %29 = vector.broadcast %cst_14 : f32 to vector<16x128xf32>
    %30 = arith.addf %29, %28 : vector<16x128xf32>
    %31 = arith.mulf %17, %30 : vector<16x128xf32>
    %cst_15 = arith.constant 0.000000e+00 : f32
    %32 = vector.broadcast %cst_15 : f32 to vector<16x128xf32>
    %33 = arith.subf %32, %11 : vector<16x128xf32>
    %34 = arith.mulf %33, %11 : vector<16x128xf32>
    %35 = math.exp %34 : vector<16x128xf32>
    %36 = arith.mulf %31, %35 : vector<16x128xf32>
    %cst_16 = arith.constant 0.000000e+00 : f32
    %37 = vector.broadcast %cst_16 : f32 to vector<16x128xf32>
    %38 = arith.cmpf oge, %8, %37 : vector<16x128xf32>
    %cst_17 = arith.constant 2.000000e+00 : f32
    %39 = vector.broadcast %cst_17 : f32 to vector<16x128xf32>
    %40 = arith.subf %39, %36 : vector<16x128xf32>
    %41 = arith.select %38, %40, %36 : vector<16x128xi1>, vector<16x128xf32>
    %cst_18 = arith.constant 5.000000e-01 : f32
    %42 = vector.broadcast %cst_18 : f32 to vector<16x128xf32>
    %43 = arith.mulf %42, %8 : vector<16x128xf32>
    %44 = arith.mulf %43, %41 : vector<16x128xf32>
    %c0_19 = arith.constant 0 : index
    %c0_20 = arith.constant 0 : index
    %45 = vector.load %arg8[%c0_19, %c0_20] : memref<16x32xf32, #tpu.memory_space<vmem>>, vector<16x32xf32>
    %c0_21 = arith.constant 0 : index
    %c0_22 = arith.constant 0 : index
    %46 = vector.load %arg5[%c0_21, %c0_22] : memref<128x32xf32, #tpu.memory_space<vmem>>, vector<128x32xf32>
    %cst_23 = arith.constant dense<0.000000e+00> : vector<16x32xf32>
    %47 = tpu.matmul %44, %46, %cst_23 {dimension_numbers = #tpu.dot_dimension_numbers<[1], [0], [0], [1], [0, 0, 1, 1], [], []>} : vector<16x128xf32>, vector<128x32xf32>, vector<16x32xf32> -> vector<16x32xf32>
    %48 = arith.addf %45, %47 : vector<16x32xf32>
    %c0_24 = arith.constant 0 : index
    %c0_25 = arith.constant 0 : index
    %49 = vector.load %arg8[%c0_24, %c0_25] : memref<16x32xf32, #tpu.memory_space<vmem>>, vector<16x32xf32>
    tpu.vector_store %arg8[%c0_24, %c0_25], %48 {strides = array<i32>} : memref<16x32xf32, #tpu.memory_space<vmem>>, vector<16x32xf32>,
    %c0_i32_26 = arith.constant 0 : i32
    %50 = arith.cmpi eq, %arg1, %c0_i32_26 : i32
    %51 = arith.extui %50 : i1 to i32
    %c0_i32_27 = arith.constant 0 : i32
    %52 = arith.cmpi ne, %51, %c0_i32_27 : i32
    scf.if %52 {
      %c0_28 = arith.constant 0 : index
      %c0_29 = arith.constant 0 : index
      %53 = vector.load %arg8[%c0_28, %c0_29] : memref<16x32xf32, #tpu.memory_space<vmem>>, vector<16x32xf32>
      %c0_30 = arith.constant 0 : index
      %c0_31 = arith.constant 0 : index
      %54 = vector.load %arg6[%c0_30, %c0_31] : memref<1x32xf32, #tpu.memory_space<vmem>>, vector<1x32xf32>
      %55 = vector.broadcast %54 : vector<1x32xf32> to vector<16x32xf32>
      %56 = arith.addf %53, %55 : vector<16x32xf32>
      %c0_32 = arith.constant 0 : index
      %c0_33 = arith.constant 0 : index
      %57 = vector.load %arg7[%c0_32, %c0_33] : memref<16x32xf32, #tpu.memory_space<vmem>>, vector<16x32xf32>
      tpu.vector_store %arg7[%c0_32, %c0_33], %56 {strides = array<i32>} : memref<16x32xf32, #tpu.memory_space<vmem>>, vector<16x32xf32>,
    } else {
    }
    return
  }
  func.func @transform_0(%arg0: i32, %arg1: i32) -> (i32, i32) {
    %c0_i32 = arith.constant 0 : i32
    %c0_i32_0 = arith.constant 0 : i32
    return %arg0, %c0_i32 : i32, i32
  }
  func.func @transform_1(%arg0: i32, %arg1: i32) -> (i32, i32) {
    %c0_i32 = arith.constant 0 : i32
    %c0_i32_0 = arith.constant 0 : i32
    return %c0_i32, %arg1 : i32, i32
  }
  func.func @transform_2(%arg0: i32, %arg1: i32) -> (i32, i32) {
    %c0_i32 = arith.constant 0 : i32
    %c0_i32_0 = arith.constant 0 : i32
    return %c0_i32, %arg1 : i32, i32
  }
  func.func @transform_3(%arg0: i32, %arg1: i32) -> (i32, i32) {
    %c0_i32 = arith.constant 0 : i32
    %c0_i32_0 = arith.constant 0 : i32
    return %arg1, %c0_i32 : i32, i32
  }
  func.func @transform_4(%arg0: i32, %arg1: i32) -> (i32, i32) {
    %c0_i32 = arith.constant 0 : i32
    %c0_i32_0 = arith.constant 0 : i32
    %c0_i32_1 = arith.constant 0 : i32
    return %c0_i32, %c0_i32_0 : i32, i32
  }
  func.func @transform_5(%arg0: i32, %arg1: i32) -> (i32, i32) {
    %c0_i32 = arith.constant 0 : i32
    %c0_i32_0 = arith.constant 0 : i32
    return %arg0, %c0_i32 : i32, i32
  }
}

module attributes {stable_mosaic.version = 11 : i64} {
  func.func @_mlp_kernel(%arg0: i32, %arg1: i32, %arg2: memref<16x32xf32, #tpu.memory_space<vmem>>, %arg3: memref<32x128xf32, #tpu.memory_space<vmem>>, %arg4: memref<1x128xf32, #tpu.memory_space<vmem>>, %arg5: memref<128x32xf32, #tpu.memory_space<vmem>>, %arg6: memref<1x32xf32, #tpu.memory_space<vmem>>, %arg7: memref<16x32xf32, #tpu.memory_space<vmem>>, %arg8: memref<16x32xf32, #tpu.memory_space<vmem>>) attributes {dimension_semantics = [#tpu.dimension_semantics<parallel>, #tpu.dimension_semantics<arbitrary>], iteration_bounds = array<i64: 1, 1>, scalar_prefetch = 0 : i64, scratch_operands = 1 : i64, tpu.core_type = #tpu.core_type<tc>, window_params = [{transform_indices = @transform_0, window_bounds = array<i64: 16, 32>}, {transform_indices = @transform_1, window_bounds = array<i64: 32, 128>}, {transform_indices = @transform_2, window_bounds = array<i64: 1, 128>}, {transform_indices = @transform_3, window_bounds = array<i64: 128, 32>}, {pipeline_mode = #tpu.pipeline_mode<synchronous>, transform_indices = @transform_4, window_bounds = array<i64: 1, 32>}, {transform_indices = @transform_5, window_bounds = array<i64: 16, 32>}]} {
    %c0_i32 = arith.constant 0 : i32
    %0 = arith.cmpi eq, %arg1, %c0_i32 : i32
    %1 = arith.extui %0 : i1 to i32
    %c0_i32_0 = arith.constant 0 : i32
    %2 = arith.cmpi ne, %1, %c0_i32_0 : i32
    scf.if %2 {
      %cst_28 = arith.constant 0.000000e+00 : f32
      %53 = vector.broadcast %cst_28 : f32 to vector<16x32xf32>
      %c0_29 = arith.constant 0 : index
      %c0_30 = arith.constant 0 : index
      %54 = vector.load %arg8[%c0_29, %c0_30] : memref<16x32xf32, #tpu.memory_space<vmem>>, vector<16x32xf32>
      tpu.vector_store %arg8[%c0_29, %c0_30], %53 {strides = array<i32>} : memref<16x32xf32, #tpu.memory_space<vmem>>, vector<16x32xf32>,
    } else {
    }
    %c0 = arith.constant 0 : index
    %c0_1 = arith.constant 0 : index
    %3 = vector.load %arg2[%c0, %c0_1] : memref<16x32xf32, #tpu.memory_space<vmem>>, vector<16x32xf32>
    %c0_2 = arith.constant 0 : index
    %c0_3 = arith.constant 0 : index
    %4 = vector.load %arg3[%c0_2, %c0_3] : memref<32x128xf32, #tpu.memory_space<vmem>>, vector<32x128xf32>
    %cst = arith.constant dense<0.000000e+00> : vector<16x128xf32>
    %5 = tpu.matmul %3, %4, %cst {dimension_numbers = #tpu.dot_dimension_numbers<[1], [0], [0], [1], [0, 0, 1, 1], [], []>} : vector<16x32xf32>, vector<32x128xf32>, vector<16x128xf32> -> vector<16x128xf32>
    %c0_4 = arith.constant 0 : index
    %c0_5 = arith.constant 0 : index
    %6 = vector.load %arg4[%c0_4, %c0_5] : memref<1x128xf32, #tpu.memory_space<vmem>>, vector<1x128xf32>
    %7 = vector.broadcast %6 : vector<1x128xf32> to vector<16x128xf32>
    %8 = arith.addf %5, %7 : vector<16x128xf32>
    %cst_6 = arith.constant 0.707108557 : f32
    %9 = vector.broadcast %cst_6 : f32 to vector<16x128xf32>
    %10 = arith.mulf %8, %9 : vector<16x128xf32>
    %11 = math.absf %10 : vector<16x128xf32>
    %cst_7 = arith.constant 0.327591091 : f32
    %12 = vector.broadcast %cst_7 : f32 to vector<16x128xf32>
    %13 = arith.mulf %12, %11 : vector<16x128xf32>
    %cst_8 = arith.constant 1.000000e+00 : f32
    %14 = vector.broadcast %cst_8 : f32 to vector<16x128xf32>
    %15 = arith.addf %14, %13 : vector<16x128xf32>
    %cst_9 = arith.constant 1.000000e+00 : f32
    %16 = vector.broadcast %cst_9 : f32 to vector<16x128xf32>
    %17 = arith.divf %16, %15 : vector<16x128xf32>
    %cst_10 = arith.constant 1.06140542 : f32
    %18 = vector.broadcast %cst_10 : f32 to vector<16x128xf32>
    %19 = arith.mulf %17, %18 : vector<16x128xf32>
    %cst_11 = arith.constant -1.45315206 : f32
    %20 = vector.broadcast %cst_11 : f32 to vector<16x128xf32>
    %21 = arith.addf %20, %19 : vector<16x128xf32>
    %22 = arith.mulf %17, %21 : vector<16x128xf32>
    %cst_12 = arith.constant 1.42141378 : f32
    %23 = vector.broadcast %cst_12 : f32 to vector<16x128xf32>
    %24 = arith.addf %23, %22 : vector<16x128xf32>
    %25 = arith.mulf %17, %24 : vector<16x128xf32>
    %cst_13 = arith.constant -0.284496725 : f32
    %26 = vector.broadcast %cst_13 : f32 to vector<16x128xf32>
    %27 = arith.addf %26, %25 : vector<16x128xf32>
    %28 = arith.mulf %17, %27 : vector<16x128xf32>
    %cst_14 = arith.constant 0.254829586 : f32
    %29 = vector.broadcast %cst_14 : f32 to vector<16x128xf32>
    %30 = arith.addf %29, %28 : vector<16x128xf32>
    %31 = arith.mulf %17, %30 : vector<16x128xf32>
    %cst_15 = arith.constant 0.000000e+00 : f32
    %32 = vector.broadcast %cst_15 : f32 to vector<16x128xf32>
    %33 = arith.subf %32, %11 : vector<16x128xf32>
    %34 = arith.mulf %33, %11 : vector<16x128xf32>
    %35 = math.exp %34 : vector<16x128xf32>
    %36 = arith.mulf %31, %35 : vector<16x128xf32>
    %cst_16 = arith.constant 0.000000e+00 : f32
    %37 = vector.broadcast %cst_16 : f32 to vector<16x128xf32>
    %38 = arith.cmpf oge, %8, %37 : vector<16x128xf32>
    %cst_17 = arith.constant 2.000000e+00 : f32
    %39 = vector.broadcast %cst_17 : f32 to vector<16x128xf32>
    %40 = arith.subf %39, %36 : vector<16x128xf32>
    %41 = arith.select %38, %40, %36 : vector<16x128xi1>, vector<16x128xf32>
    %cst_18 = arith.constant 5.000000e-01 : f32
    %42 = vector.broadcast %cst_18 : f32 to vector<16x128xf32>
    %43 = arith.mulf %42, %8 : vector<16x128xf32>
    %44 = arith.mulf %43, %41 : vector<16x128xf32>
    %c0_19 = arith.constant 0 : index
    %c0_20 = arith.constant 0 : index
    %45 = vector.load %arg8[%c0_19, %c0_20] : memref<16x32xf32, #tpu.memory_space<vmem>>, vector<16x32xf32>
    %c0_21 = arith.constant 0 : index
    %c0_22 = arith.constant 0 : index
    %46 = vector.load %arg5[%c0_21, %c0_22] : memref<128x32xf32, #tpu.memory_space<vmem>>, vector<128x32xf32>
    %cst_23 = arith.constant dense<0.000000e+00> : vector<16x32xf32>
    %47 = tpu.matmul %44, %46, %cst_23 {dimension_numbers = #tpu.dot_dimension_numbers<[1], [0], [0], [1], [0, 0, 1, 1], [], []>} : vector<16x128xf32>, vector<128x32xf32>, vector<16x32xf32> -> vector<16x32xf32>
    %48 = arith.addf %45, %47 : vector<16x32xf32>
    %c0_24 = arith.constant 0 : index
    %c0_25 = arith.constant 0 : index
    %49 = vector.load %arg8[%c0_24, %c0_25] : memref<16x32xf32, #tpu.memory_space<vmem>>, vector<16x32xf32>
    tpu.vector_store %arg8[%c0_24, %c0_25], %48 {strides = array<i32>} : memref<16x32xf32, #tpu.memory_space<vmem>>, vector<16x32xf32>,
    %c0_i32_26 = arith.constant 0 : i32
    %50 = arith.cmpi eq, %arg1, %c0_i32_26 : i32
    %51 = arith.extui %50 : i1 to i32
    %c0_i32_27 = arith.constant 0 : i32
    %52 = arith.cmpi ne, %51, %c0_i32_27 : i32
    scf.if %52 {
      %c0_28 = arith.constant 0 : index
      %c0_29 = arith.constant 0 : index
      %53 = vector.load %arg8[%c0_28, %c0_29] : memref<16x32xf32, #tpu.memory_space<vmem>>, vector<16x32xf32>
      %c0_30 = arith.constant 0 : index
      %c0_31 = arith.constant 0 : index
      %54 = vector.load %arg6[%c0_30, %c0_31] : memref<1x32xf32, #tpu.memory_space<vmem>>, vector<1x32xf32>
      %55 = vector.broadcast %54 : vector<1x32xf32> to vector<16x32xf32>
      %56 = arith.addf %53, %55 : vector<16x32xf32>
      %c0_32 = arith.constant 0 : index
      %c0_33 = arith.constant 0 : index
      %57 = vector.load %arg7[%c0_32, %c0_33] : memref<16x32xf32, #tpu.memory_space<vmem>>, vector<16x32xf32>
      tpu.vector_store %arg7[%c0_32, %c0_33], %56 {strides = array<i32>} : memref<16x32xf32, #tpu.memory_space<vmem>>, vector<16x32xf32>,
    } else {
    }
    return
  }
  func.func @transform_0(%arg0: i32, %arg1: i32) -> (i32, i32) {
    %c0_i32 = arith.constant 0 : i32
    %c0_i32_0 = arith.constant 0 : i32
    return %arg0, %c0_i32 : i32, i32
  }
  func.func @transform_1(%arg0: i32, %arg1: i32) -> (i32, i32) {
    %c0_i32 = arith.constant 0 : i32
    %c0_i32_0 = arith.constant 0 : i32
    return %c0_i32, %arg1 : i32, i32
  }
  func.func @transform_2(%arg0: i32, %arg1: i32) -> (i32, i32) {
    %c0_i32 = arith.constant 0 : i32
    %c0_i32_0 = arith.constant 0 : i32
    return %c0_i32, %arg1 : i32, i32
  }
  func.func @transform_3(%arg0: i32, %arg1: i32) -> (i32, i32) {
    %c0_i32 = arith.constant 0 : i32
    %c0_i32_0 = arith.constant 0 : i32
    return %arg1, %c0_i32 : i32, i32
  }
  func.func @transform_4(%arg0: i32, %arg1: i32) -> (i32, i32) {
    %c0_i32 = arith.constant 0 : i32
    %c0_i32_0 = arith.constant 0 : i32
    %c0_i32_1 = arith.constant 0 : i32
    return %c0_i32, %c0_i32_0 : i32, i32
  }
  func.func @transform_5(%arg0: i32, %arg1: i32) -> (i32, i32) {
    %c0_i32 = arith.constant 0 : i32
    %c0_i32_0 = arith.constant 0 : i32
    return %arg0, %c0_i32 : i32, i32
  }
}

</mosaic_0001>

<bundles_post_ra>
// kernel: tpu_custom_call.1
= control target key start
LH: loop header
LB: loop body
LE: loop exit
PB: predicated region body
PF: predicated region fallthrough
CT: control target
= control target key end

     0   :  { %vm25_vm0 = vcmask 261120   ;;  %s578_s0 = inlined_call_operand.vmem [shape: f32[16,32], index: 0, kind: input, shape index: {}]   ;;  %s579_s1 = inlined_call_operand.vmem [shape: f32[32,128], index: 1, kind: input, shape index: {}]   ;;  %s580_s2 = inlined_call_operand.vmem [shape: f32[1,128], index: 2, kind: input, shape index: {}]   ;;  %s581_s3 = inlined_call_operand.vmem [shape: f32[128,32], index: 3, kind: input, shape index: {}]   ;;  %s582_s4 = inlined_call_operand.vmem [shape: f32[1,32], index: 4, kind: input, shape index: {}]   ;;  %s583_s5 = inlined_call_operand.hbm [shape: f32[16,32], index: 5, kind: output, shape index: {}]  }
   0x1   :  { %v30_v0 = vld [vmem:[%s579_s1] sm:$0xff]  ;;  %v31_v1 = vld [vmem:[%s579_s1 + $0x8] sm:$0xff]  ;;  %v32_v2 = vld [vmem:[%s579_s1 + $0x10] sm:$0xff] }
   0x2   :  { %v376_v3 = vpack.c.bf16 %v31_v1, %v30_v0  ;;  %v33_v4 = vld [vmem:[%s579_s1 + $0x18] sm:$0xff]  ;;  %v28_v5 = vld [vmem:[%s578_s0] sm:$0xff] }
   0x3   :  { %v380_v6 = vpack.c.bf16 %v33_v4, %v32_v2  ;;  %338 = vmatprep.mubr.msk.f32.mxu0 %vm25_vm0, %v28_v5 }
   0x4   :  { %10 = vsyncpa [#allocation4], 0  ;;  %377 = vmatprep.subr.bf16.mxu0 %v376_v3  ;;  %v29_v7 = vld [vmem:[%s578_s0 + $0x8] sm:$0xff]  ;;  %v175_v8 = vld [vmem:[%s581_s3] sm:$0xff]  ;;  %v452_v32 = vmov 0.0   ;;  %s453_s11 = smov [#allocation3]  }
   0x5   :  { %379 = vmatpush3.bf16.msra.mxu0 %v376_v3  ;;  %v176_v9 = vld [vmem:[%s581_s3 + $0x8] sm:$0xff]  ;;  %v177_v10 = vld [vmem:[%s581_s3 + $0x10] sm:$0xff]  ;;  %v178_v12 = vld [vmem:[%s581_s3 + $0x18] sm:$0xff]  ;;  %27 = vst.msk [vmem:[#allocation2 + $0x8] sm:$0xff] %vm25_vm0, %v452_v32  ;;  %s291_s0 = sshll.u32 %s453_s11, 4  ;;  %s292_s0 = int_to_ptr.vmem [resolvable:$true] %s291_s0 }
   0x6   :  { %381 = vmatprep.subr.bf16.mxu0 %v380_v6  ;;  %v384_v11 = vpack.c.bf16 %v176_v9, %v175_v8  ;;  %v388_v13 = vpack.c.bf16 %v178_v12, %v177_v10  ;;  %v179_v14 = vld [vmem:[%s581_s3 + $0x20] sm:$0xff]  ;;  %v180_v15 = vld [vmem:[%s581_s3 + $0x28] sm:$0xff]  ;;  %v181_v17 = vld [vmem:[%s581_s3 + $0x30] sm:$0xff]  ;;  %26 = vst.msk [vmem:[#allocation2] sm:$0xff] %vm25_vm0, %v452_v32  ;;  %s428_s12 = scalar_lea.vmem %s292_s0, 256  ;;  %p433_p1 = scmp.lt.s32.totalorder %s292_s0, %s292_s0 }
   0x7   :  { %v392_v16 = vpack.c.bf16 %v180_v15, %v179_v14  ;;  %v182_v18 = vld [vmem:[%s581_s3 + $0x38] sm:$0xff]  ;;  %v183_v20 = vld [vmem:[%s581_s3 + $0x40] sm:$0xff]  ;;  %v184_v21 = vld [vmem:[%s581_s3 + $0x48] sm:$0xff]  ;;  %p429_p0 = scmp.ne.s32.totalorder %s292_s0, %s428_s12  ;;  %p434_p2 = scmp.lt.s32.totalorder %s428_s12, %s428_s12 }
   0x8   :  { %385 = vmatprep.subr.bf16.mxu1 %v384_v11  ;;  %v396_v19 = vpack.c.bf16 %v182_v18, %v181_v17  ;;  %v400_v22 = vpack.c.bf16 %v184_v21, %v183_v20  ;;  %v185_v23 = vld [vmem:[%s581_s3 + $0x50] sm:$0xff]  ;;  %v186_v24 = vld [vmem:[%s581_s3 + $0x58] sm:$0xff]  ;;  %v187_v26 = vld [vmem:[%s581_s3 + $0x60] sm:$0xff] }
   0x9   :  { %383 = vmatpush3.bf16.msra.mxu0 %v380_v6  ;;  %387 = vmatpush3.bf16.msra.mxu1 %v384_v11  ;;  %v404_v25 = vpack.c.bf16 %v186_v24, %v185_v23  ;;  %v188_v27 = vld [vmem:[%s581_s3 + $0x68] sm:$0xff]  ;;  %v189_v29 = vld [vmem:[%s581_s3 + $0x70] sm:$0xff]  ;;  %v190_v30 = vld [vmem:[%s581_s3 + $0x78] sm:$0xff]  ;;  %p435_p3 = por %p434_p2, %p433_p1 }
   0xa   :  { %389 = vmatprep.subr.bf16.mxu1 %v388_v13  ;;  %v408_v28 = vpack.c.bf16 %v188_v27, %v187_v26  ;;  %v412_v31 = vpack.c.bf16 %v190_v30, %v189_v29  ;;  %v302_v33 = vld [vmem:[%s580_s2] ss:$0 sm:$0xff] }
   0xb   :  { %v305_v26 = vld [vmem:[%s582_s4] ss:$0 sm:$0xff]  ;;  %p436_p4 = pnand %p435_p3, %p429_p0 }
   0xc   :  { %339 = vmatmul.mubr.msk.f32.vlgmr.msra.gmra.mrb[0].mxu0 %vm25_vm0, %v29_v7  ;;  %v174_v20 = vld [vmem:[#allocation2 + $0x8] sm:$0xff] }
   0xd   :  { %391 = vmatpush3.bf16.msra.mxu1 %v388_v13  ;;  %v173_v21 = vld [vmem:[#allocation2] sm:$0xff] }
   0xe   :  { %393 = vmatprep.subr.bf16.mxu1 %v392_v16 }
  0x11   :  { %395 = vmatpush3.bf16.msra.mxu1 %v392_v16 }
  0x12   :  { %397 = vmatprep.subr.bf16.mxu1 %v396_v19 }
  0x15   :  { %399 = vmatpush3.bf16.msra.mxu1 %v396_v19 }
  0x16   :  { %401 = vmatprep.subr.bf16.mxu1 %v400_v22 }
  0x19   :  { %403 = vmatpush3.bf16.msra.mxu1 %v400_v22 }
  0x1a   :  { %405 = vmatprep.subr.bf16.mxu1 %v404_v25 }
  0x1d   :  { %407 = vmatpush3.bf16.msra.mxu1 %v404_v25 }
  0x1e   :  { %409 = vmatprep.subr.bf16.mxu1 %v408_v28 }
  0x21   :  { %411 = vmatpush3.bf16.msra.mxu1 %v408_v28 }
  0x22   :  { %413 = vmatprep.subr.bf16.mxu1 %v412_v31 }
  0x25   :  { %415 = vmatpush3.bf16.msra.mxu1 %v412_v31 }
  0xdf   :  { %v340_v34 = vpop.f32.mrb[0].mxu0 }
  0xe0   :  { %v120_v35 = vadd.f32 %v340_v34, %v302_v33  ;;  %v114_v36 = vpop.f32.mrb[1].mxu0 }
  0xe1   :  { %v115_v37 = vadd.f32 %v302_v33, %v114_v36 }
  0xe2   :  { %v124_v38 = vmul.f32 0.70710856, %v120_v35  ;;  %vm164_vm1 = vcmp.ge.f32.partialorder %v120_v35, 0.0  ;;  %v170_v16 = vmul.f32 0.5, %v120_v35 }
  0xe3   :  { %v123_v39 = vmul.f32 0.70710856, %v115_v37  ;;  %vm163_vm2 = vcmp.ge.f32.partialorder %v115_v37, 0.0  ;;  %v169_v14 = vmul.f32 0.5, %v115_v37 }
  0xe4   :  { %v126_v40 = vand.u32 2147483647, %v124_v38 }
  0xe5   :  { %v125_v41 = vand.u32 2147483647, %v123_v39 }
  0xe6   :  { %v128_v42 = vmul.f32 0.3275911, %v126_v40  ;;  %v154_v46 = vsub.f32 0.0, %v126_v40 }
  0xe7   :  { %v127_v43 = vmul.f32 0.3275911, %v125_v41  ;;  %v153_v47 = vsub.f32 0.0, %v125_v41 }
  0xe8   :  { %v130_v44 = vadd.f32 1.0, %v128_v42  ;;  %v156_v49 = vmul.f32 %v154_v46, %v126_v40 }
  0xe9   :  { %v129_v45 = vadd.f32 1.0, %v127_v43  ;;  %v155_v51 = vmul.f32 %v153_v47, %v125_v41 }
  0xea   :  { %420 = vrcp.f32 %v130_v44  ;;  %v159_v55 = vmul.f32 1.442695, %v156_v49 }
  0xeb   :  { %422 = vrcp.f32 %v129_v45  ;;  %v157_v57 = vmul.f32 1.442695, %v155_v51 }
  0xec   :  { %424 = vpow2.f32 %v159_v55 }
  0xed   :  { %426 = vpow2.f32 %v157_v57 }
  0xf4   :  { %v421_v48 = vpop.eup %420 }
  0xf5   :  { %v423_v50 = vpop.eup %422  ;;  %v136_v52 = vmul.f32 1.0614054, %v421_v48 }
  0xf6   :  { %v135_v53 = vmul.f32 1.0614054, %v423_v50  ;;  %v425_v7 = vpop.eup %424 }
  0xf7   :  { %v138_v54 = vadd.f32 -1.4531521, %v136_v52  ;;  %v427_v9 = vpop.eup %426 }
  0xf8   :  { %v137_v56 = vadd.f32 -1.4531521, %v135_v53 }
  0xf9   :  { %v140_v58 = vmul.f32 %v421_v48, %v138_v54 }
  0xfa   :  { %v139_v59 = vmul.f32 %v423_v50, %v137_v56 }
  0xfb   :  { %v142_v60 = vadd.f32 1.4214138, %v140_v58 }
  0xfc   :  { %v141_v61 = vadd.f32 1.4214138, %v139_v59 }
  0xfd   :  { %v144_v62 = vmul.f32 %v421_v48, %v142_v60 }
  0xfe   :  { %v143_v63 = vmul.f32 %v423_v50, %v141_v61 }
  0xff   :  { %v146_v0 = vadd.f32 -0.28449672, %v144_v62 }
 0x100   :  { %v145_v1 = vadd.f32 -0.28449672, %v143_v63 }
 0x101   :  { %v148_v2 = vmul.f32 %v421_v48, %v146_v0 }
 0x102   :  { %v147_v3 = vmul.f32 %v423_v50, %v145_v1 }
 0x103   :  { %v150_v4 = vadd.f32 0.2548296, %v148_v2 }
 0x104   :  { %v149_v5 = vadd.f32 0.2548296, %v147_v3 }
 0x105   :  { %v152_v6 = vmul.f32 %v421_v48, %v150_v4 }
 0x106   :  { %v151_v8 = vmul.f32 %v423_v50, %v149_v5 }
 0x107   :  { %v162_v10 = vmul.f32 %v425_v7, %v152_v6 }
 0x108   :  { %v161_v11 = vmul.f32 %v427_v9, %v151_v8 }
 0x109   :  { %v166_v12 = vsub.f32 2.0, %v162_v10 }
 0x10a   :  { %v165_v13 = vsub.f32 2.0, %v161_v11 }
 0x10b   :  { %v168_v15 = vsel %vm164_vm1, %v166_v12, %v162_v10 }
 0x10c   :  { %v167_v17 = vsel %vm163_vm2, %v165_v13, %v161_v11  ;;  %v172_v19 = vmul.f32 %v170_v16, %v168_v15 }
 0x10d   :  { %v171_v18 = vmul.f32 %v169_v14, %v167_v17 }
 0x10f   :  { %373 = vmatprep.mubr.f32.mxu1 %v171_v18 }
 0x110   :  { %374 = vmatmul.mubr.f32.vlgmr.msra.gmra.mrb[0].mxu1 %v172_v19 }
 0x1e3   :  { %v375_v22 = vpop.f32.mrb[0].mxu1 }
 0x1e4   :  { %v267_v23 = vadd.f32 %v375_v22, %v174_v20  ;;  %v257_v24 = vpop.f32.mrb[1].mxu1 }
 0x1e5   :  { %v266_v25 = vadd.f32 %v257_v24, %v173_v21 }
 0x1e6   :  { %269 = vst.msk [vmem:[#allocation2 + $0x8] sm:$0xff] %vm25_vm0, %v267_v23 }
 0x1e7   :  { %268 = vst.msk [vmem:[#allocation2] sm:$0xff] %vm25_vm0, %v266_v25 }
 0x1ed   :  { %v274_v27 = vld [vmem:[#allocation2 + $0x8] sm:$0xff] }
 0x1ee   :  { %v273_v28 = vld [vmem:[#allocation2] sm:$0xff]  ;;  %v283_v29 = vadd.f32 %v305_v26, %v274_v27 }
 0x1ef   :  { %v282_v30 = vadd.f32 %v305_v26, %v273_v28 }
 0x1f0   :  { %285 = vst.msk [vmem:[#allocation3 + $0x8] sm:$0xff] %vm25_vm0, %v283_v29 }
 0x1f1   :  { %284 = vst.msk [vmem:[#allocation3] sm:$0xff] %vm25_vm0, %v282_v30 }
 0x1f2   :  { %439 = shalt.err (!%p436_p4)
}
 0x1f3   :  { %s440_s14 = scalar_lea.hbm %s583_s5, 256 }
 0x1f4   :  { %p441_p5 = scmp.ne.s32.totalorder %s583_s5, %s440_s14  ;;  %p444_p6 = scmp.lt.u32.totalorder %s440_s14, %s583_s5 }
 0x1f6   :  { %p446_p7 = pnand %p444_p6, %p441_p5 }
 0x1f8   :  { %449 = shalt.err (!%p446_p7)
}
 0x1f9   :  { %s454_s19 = smov 128   ;;  %s455_s20 = smov 8  }
 0x1fa   :  { %297 = dma.vmem_to_hbm [thread:$0]  %s292_s0, 256, %s583_s5, [#allocation4], %s454_s19, %s454_s19, %s455_s20  }
 0x1fb   :  { %450 = dma.done.wait [#allocation4], 256  }
 0x1fc   :  { %451 = vsyncadd [#allocation4], 4294967040 }
 0x1fd   :  { %301 = vsyncpa [#allocation4], 1 }

// kernel: tpu_custom_call.1
= control target key start
LH: loop header
LB: loop body
LE: loop exit
PB: predicated region body
PF: predicated region fallthrough
CT: control target
= control target key end

     0   :  { %vm25_vm0 = vcmask 261120   ;;  %s578_s0 = inlined_call_operand.vmem [shape: f32[16,32], index: 0, kind: input, shape index: {}]   ;;  %s579_s1 = inlined_call_operand.vmem [shape: f32[32,128], index: 1, kind: input, shape index: {}]   ;;  %s580_s2 = inlined_call_operand.vmem [shape: f32[1,128], index: 2, kind: input, shape index: {}]   ;;  %s581_s3 = inlined_call_operand.vmem [shape: f32[128,32], index: 3, kind: input, shape index: {}]   ;;  %s582_s4 = inlined_call_operand.vmem [shape: f32[1,32], index: 4, kind: input, shape index: {}]   ;;  %s583_s5 = inlined_call_operand.hbm [shape: f32[16,32], index: 5, kind: output, shape index: {}]  }
   0x1   :  { %v30_v0 = vld [vmem:[%s579_s1] sm:$0xff]  ;;  %v31_v1 = vld [vmem:[%s579_s1 + $0x8] sm:$0xff]  ;;  %v32_v2 = vld [vmem:[%s579_s1 + $0x10] sm:$0xff] }
   0x2   :  { %v376_v3 = vpack.c.bf16 %v31_v1, %v30_v0  ;;  %v33_v4 = vld [vmem:[%s579_s1 + $0x18] sm:$0xff]  ;;  %v28_v5 = vld [vmem:[%s578_s0] sm:$0xff] }
   0x3   :  { %v380_v6 = vpack.c.bf16 %v33_v4, %v32_v2  ;;  %338 = vmatprep.mubr.msk.f32.mxu0 %vm25_vm0, %v28_v5 }
   0x4   :  { %10 = vsyncpa [#allocation4], 0  ;;  %377 = vmatprep.subr.bf16.mxu0 %v376_v3  ;;  %v29_v7 = vld [vmem:[%s578_s0 + $0x8] sm:$0xff]  ;;  %v175_v8 = vld [vmem:[%s581_s3] sm:$0xff]  ;;  %v452_v32 = vmov 0.0   ;;  %s453_s11 = smov [#allocation3]  }
   0x5   :  { %379 = vmatpush3.bf16.msra.mxu0 %v376_v3  ;;  %v176_v9 = vld [vmem:[%s581_s3 + $0x8] sm:$0xff]  ;;  %v177_v10 = vld [vmem:[%s581_s3 + $0x10] sm:$0xff]  ;;  %v178_v12 = vld [vmem:[%s581_s3 + $0x18] sm:$0xff]  ;;  %27 = vst.msk [vmem:[#allocation2 + $0x8] sm:$0xff] %vm25_vm0, %v452_v32  ;;  %s291_s0 = sshll.u32 %s453_s11, 4  ;;  %s292_s0 = int_to_ptr.vmem [resolvable:$true] %s291_s0 }
   0x6   :  { %381 = vmatprep.subr.bf16.mxu0 %v380_v6  ;;  %v384_v11 = vpack.c.bf16 %v176_v9, %v175_v8  ;;  %v388_v13 = vpack.c.bf16 %v178_v12, %v177_v10  ;;  %v179_v14 = vld [vmem:[%s581_s3 + $0x20] sm:$0xff]  ;;  %v180_v15 = vld [vmem:[%s581_s3 + $0x28] sm:$0xff]  ;;  %v181_v17 = vld [vmem:[%s581_s3 + $0x30] sm:$0xff]  ;;  %26 = vst.msk [vmem:[#allocation2] sm:$0xff] %vm25_vm0, %v452_v32  ;;  %s428_s12 = scalar_lea.vmem %s292_s0, 256  ;;  %p433_p1 = scmp.lt.s32.totalorder %s292_s0, %s292_s0 }
   0x7   :  { %v392_v16 = vpack.c.bf16 %v180_v15, %v179_v14  ;;  %v182_v18 = vld [vmem:[%s581_s3 + $0x38] sm:$0xff]  ;;  %v183_v20 = vld [vmem:[%s581_s3 + $0x40] sm:$0xff]  ;;  %v184_v21 = vld [vmem:[%s581_s3 + $0x48] sm:$0xff]  ;;  %p429_p0 = scmp.ne.s32.totalorder %s292_s0, %s428_s12  ;;  %p434_p2 = scmp.lt.s32.totalorder %s428_s12, %s428_s12 }
   0x8   :  { %385 = vmatprep.subr.bf16.mxu1 %v384_v11  ;;  %v396_v19 = vpack.c.bf16 %v182_v18, %v181_v17  ;;  %v400_v22 = vpack.c.bf16 %v184_v21, %v183_v20  ;;  %v185_v23 = vld [vmem:[%s581_s3 + $0x50] sm:$0xff]  ;;  %v186_v24 = vld [vmem:[%s581_s3 + $0x58] sm:$0xff]  ;;  %v187_v26 = vld [vmem:[%s581_s3 + $0x60] sm:$0xff] }
   0x9   :  { %383 = vmatpush3.bf16.msra.mxu0 %v380_v6  ;;  %387 = vmatpush3.bf16.msra.mxu1 %v384_v11  ;;  %v404_v25 = vpack.c.bf16 %v186_v24, %v185_v23  ;;  %v188_v27 = vld [vmem:[%s581_s3 + $0x68] sm:$0xff]  ;;  %v189_v29 = vld [vmem:[%s581_s3 + $0x70] sm:$0xff]  ;;  %v190_v30 = vld [vmem:[%s581_s3 + $0x78] sm:$0xff]  ;;  %p435_p3 = por %p434_p2, %p433_p1 }
   0xa   :  { %389 = vmatprep.subr.bf16.mxu1 %v388_v13  ;;  %v408_v28 = vpack.c.bf16 %v188_v27, %v187_v26  ;;  %v412_v31 = vpack.c.bf16 %v190_v30, %v189_v29  ;;  %v302_v33 = vld [vmem:[%s580_s2] ss:$0 sm:$0xff] }
   0xb   :  { %v305_v26 = vld [vmem:[%s582_s4] ss:$0 sm:$0xff]  ;;  %p436_p4 = pnand %p435_p3, %p429_p0 }
   0xc   :  { %339 = vmatmul.mubr.msk.f32.vlgmr.msra.gmra.mrb[0].mxu0 %vm25_vm0, %v29_v7  ;;  %v174_v20 = vld [vmem:[#allocation2 + $0x8] sm:$0xff] }
   0xd   :  { %391 = vmatpush3.bf16.msra.mxu1 %v388_v13  ;;  %v173_v21 = vld [vmem:[#allocation2] sm:$0xff] }
   0xe   :  { %393 = vmatprep.subr.bf16.mxu1 %v392_v16 }
  0x11   :  { %395 = vmatpush3.bf16.msra.mxu1 %v392_v16 }
  0x12   :  { %397 = vmatprep.subr.bf16.mxu1 %v396_v19 }
  0x15   :  { %399 = vmatpush3.bf16.msra.mxu1 %v396_v19 }
  0x16   :  { %401 = vmatprep.subr.bf16.mxu1 %v400_v22 }
  0x19   :  { %403 = vmatpush3.bf16.msra.mxu1 %v400_v22 }
  0x1a   :  { %405 = vmatprep.subr.bf16.mxu1 %v404_v25 }
  0x1d   :  { %407 = vmatpush3.bf16.msra.mxu1 %v404_v25 }
  0x1e   :  { %409 = vmatprep.subr.bf16.mxu1 %v408_v28 }
  0x21   :  { %411 = vmatpush3.bf16.msra.mxu1 %v408_v28 }
  0x22   :  { %413 = vmatprep.subr.bf16.mxu1 %v412_v31 }
  0x25   :  { %415 = vmatpush3.bf16.msra.mxu1 %v412_v31 }
  0xdf   :  { %v340_v34 = vpop.f32.mrb[0].mxu0 }
  0xe0   :  { %v120_v35 = vadd.f32 %v340_v34, %v302_v33  ;;  %v114_v36 = vpop.f32.mrb[1].mxu0 }
  0xe1   :  { %v115_v37 = vadd.f32 %v302_v33, %v114_v36 }
  0xe2   :  { %v124_v38 = vmul.f32 0.70710856, %v120_v35  ;;  %vm164_vm1 = vcmp.ge.f32.partialorder %v120_v35, 0.0  ;;  %v170_v16 = vmul.f32 0.5, %v120_v35 }
  0xe3   :  { %v123_v39 = vmul.f32 0.70710856, %v115_v37  ;;  %vm163_vm2 = vcmp.ge.f32.partialorder %v115_v37, 0.0  ;;  %v169_v14 = vmul.f32 0.5, %v115_v37 }
  0xe4   :  { %v126_v40 = vand.u32 2147483647, %v124_v38 }
  0xe5   :  { %v125_v41 = vand.u32 2147483647, %v123_v39 }
  0xe6   :  { %v128_v42 = vmul.f32 0.3275911, %v126_v40  ;;  %v154_v46 = vsub.f32 0.0, %v126_v40 }
  0xe7   :  { %v127_v43 = vmul.f32 0.3275911, %v125_v41  ;;  %v153_v47 = vsub.f32 0.0, %v125_v41 }
  0xe8   :  { %v130_v44 = vadd.f32 1.0, %v128_v42  ;;  %v156_v49 = vmul.f32 %v154_v46, %v126_v40 }
  0xe9   :  { %v129_v45 = vadd.f32 1.0, %v127_v43  ;;  %v155_v51 = vmul.f32 %v153_v47, %v125_v41 }
  0xea   :  { %420 = vrcp.f32 %v130_v44  ;;  %v159_v55 = vmul.f32 1.442695, %v156_v49 }
  0xeb   :  { %422 = vrcp.f32 %v129_v45  ;;  %v157_v57 = vmul.f32 1.442695, %v155_v51 }
  0xec   :  { %424 = vpow2.f32 %v159_v55 }
  0xed   :  { %426 = vpow2.f32 %v157_v57 }
  0xf4   :  { %v421_v48 = vpop.eup %420 }
  0xf5   :  { %v423_v50 = vpop.eup %422  ;;  %v136_v52 = vmul.f32 1.0614054, %v421_v48 }
  0xf6   :  { %v135_v53 = vmul.f32 1.0614054, %v423_v50  ;;  %v425_v7 = vpop.eup %424 }
  0xf7   :  { %v138_v54 = vadd.f32 -1.4531521, %v136_v52  ;;  %v427_v9 = vpop.eup %426 }
  0xf8   :  { %v137_v56 = vadd.f32 -1.4531521, %v135_v53 }
  0xf9   :  { %v140_v58 = vmul.f32 %v421_v48, %v138_v54 }
  0xfa   :  { %v139_v59 = vmul.f32 %v423_v50, %v137_v56 }
  0xfb   :  { %v142_v60 = vadd.f32 1.4214138, %v140_v58 }
  0xfc   :  { %v141_v61 = vadd.f32 1.4214138, %v139_v59 }
  0xfd   :  { %v144_v62 = vmul.f32 %v421_v48, %v142_v60 }
  0xfe   :  { %v143_v63 = vmul.f32 %v423_v50, %v141_v61 }
  0xff   :  { %v146_v0 = vadd.f32 -0.28449672, %v144_v62 }
 0x100   :  { %v145_v1 = vadd.f32 -0.28449672, %v143_v63 }
 0x101   :  { %v148_v2 = vmul.f32 %v421_v48, %v146_v0 }
 0x102   :  { %v147_v3 = vmul.f32 %v423_v50, %v145_v1 }
 0x103   :  { %v150_v4 = vadd.f32 0.2548296, %v148_v2 }
 0x104   :  { %v149_v5 = vadd.f32 0.2548296, %v147_v3 }
 0x105   :  { %v152_v6 = vmul.f32 %v421_v48, %v150_v4 }
 0x106   :  { %v151_v8 = vmul.f32 %v423_v50, %v149_v5 }
 0x107   :  { %v162_v10 = vmul.f32 %v425_v7, %v152_v6 }
 0x108   :  { %v161_v11 = vmul.f32 %v427_v9, %v151_v8 }
 0x109   :  { %v166_v12 = vsub.f32 2.0, %v162_v10 }
 0x10a   :  { %v165_v13 = vsub.f32 2.0, %v161_v11 }
 0x10b   :  { %v168_v15 = vsel %vm164_vm1, %v166_v12, %v162_v10 }
 0x10c   :  { %v167_v17 = vsel %vm163_vm2, %v165_v13, %v161_v11  ;;  %v172_v19 = vmul.f32 %v170_v16, %v168_v15 }
 0x10d   :  { %v171_v18 = vmul.f32 %v169_v14, %v167_v17 }
 0x10f   :  { %373 = vmatprep.mubr.f32.mxu1 %v171_v18 }
 0x110   :  { %374 = vmatmul.mubr.f32.vlgmr.msra.gmra.mrb[0].mxu1 %v172_v19 }
 0x1e3   :  { %v375_v22 = vpop.f32.mrb[0].mxu1 }
 0x1e4   :  { %v267_v23 = vadd.f32 %v375_v22, %v174_v20  ;;  %v257_v24 = vpop.f32.mrb[1].mxu1 }
 0x1e5   :  { %v266_v25 = vadd.f32 %v257_v24, %v173_v21 }
 0x1e6   :  { %269 = vst.msk [vmem:[#allocation2 + $0x8] sm:$0xff] %vm25_vm0, %v267_v23 }
 0x1e7   :  { %268 = vst.msk [vmem:[#allocation2] sm:$0xff] %vm25_vm0, %v266_v25 }
 0x1ed   :  { %v274_v27 = vld [vmem:[#allocation2 + $0x8] sm:$0xff] }
 0x1ee   :  { %v273_v28 = vld [vmem:[#allocation2] sm:$0xff]  ;;  %v283_v29 = vadd.f32 %v305_v26, %v274_v27 }
 0x1ef   :  { %v282_v30 = vadd.f32 %v305_v26, %v273_v28 }
 0x1f0   :  { %285 = vst.msk [vmem:[#allocation3 + $0x8] sm:$0xff] %vm25_vm0, %v283_v29 }
 0x1f1   :  { %284 = vst.msk [vmem:[#allocation3] sm:$0xff] %vm25_vm0, %v282_v30 }
 0x1f2   :  { %439 = shalt.err (!%p436_p4)
}
 0x1f3   :  { %s440_s14 = scalar_lea.hbm %s583_s5, 256 }
 0x1f4   :  { %p441_p5 = scmp.ne.s32.totalorder %s583_s5, %s440_s14  ;;  %p444_p6 = scmp.lt.u32.totalorder %s440_s14, %s583_s5 }
 0x1f6   :  { %p446_p7 = pnand %p444_p6, %p441_p5 }
 0x1f8   :  { %449 = shalt.err (!%p446_p7)
}
 0x1f9   :  { %s454_s19 = smov 128   ;;  %s455_s20 = smov 8  }
 0x1fa   :  { %297 = dma.vmem_to_hbm [thread:$0]  %s292_s0, 256, %s583_s5, [#allocation4], %s454_s19, %s454_s19, %s455_s20  }
 0x1fb   :  { %450 = dma.done.wait [#allocation4], 256  }
 0x1fc   :  { %451 = vsyncadd [#allocation4], 4294967040 }
 0x1fd   :  { %301 = vsyncpa [#allocation4], 1 }

</bundles_post_ra>
